<compile_context>
chip_gen: v7x
topology: tpu7x:2x2x1
jax: 0.10.0
libtpu: 0.0.40
codegen_flags: <defaults>
</compile_context>

<pallas_src>
import jax
import jax.numpy as jnp
from jax.experimental import pallas as pl
from jax.experimental.pallas import tpu as pltpu


def _round_up(n, m):
    return ((n + m - 1) // m) * m


def mlp_kernel(x_ref, w1_ref, b1_ref, w2_ref, b2_ref, w3_ref, b3_ref, o_ref):
    # Layer 1: Linear + ReLU. MXU matmul with f32 accumulate; bias/ReLU stay f32
    # in every path (v5e-safe elementwise).
    x = x_ref[...].astype(w1_ref.dtype)  # no-op cast in both f32 and bf16 paths
    h1 = jnp.dot(x, w1_ref[...], preferred_element_type=jnp.float32)
    h1 = jnp.maximum(h1 + b1_ref[...], 0.0)
    # Layer 2: Linear + ReLU.
    h2 = jnp.dot(h1.astype(w2_ref.dtype), w2_ref[...],
                 preferred_element_type=jnp.float32)
    h2 = jnp.maximum(h2 + b2_ref[...], 0.0)
    # Layer 3: Linear. Output stored at true class width (lane-masked store;
    # far fewer HBM bytes than a 128-padded slab).
    out = jnp.dot(h2.astype(w3_ref.dtype), w3_ref[...],
                  preferred_element_type=jnp.float32)
    o_ref[...] = (out + b3_ref[...]).astype(o_ref.dtype)


def mlp_forward(x, w1, b1, w2, b2, w3, b3, *, tile_b=1024, use_bf16=False):
    """y = relu(relu(x @ w1 + b1) @ w2 + b2) @ w3 + b3 (PyTorch Model.forward)."""
    batch, in_f = x.shape
    d1 = w1.shape[1]
    d2 = w2.shape[1]
    cls = w3.shape[1]

    b1 = b1.reshape(1, d1)
    b2 = b2.reshape(1, d2)
    b3 = b3.reshape(1, cls)

    if use_bf16:
        # Recommended for large batches (especially v5e): halves x + weight HBM
        # bytes; accumulation and bias/ReLU remain f32. Intermediates are cast
        # to bf16 between layers (lossier than weights-only bf16 — documented).
        x = x.astype(jnp.bfloat16)
        w1 = w1.astype(jnp.bfloat16)
        w2 = w2.astype(jnp.bfloat16)
        w3 = w3.astype(jnp.bfloat16)

    # Batch tile: sublane-aligned for the x dtype (8 f32 / 16 bf16), or exactly
    # `batch` when one block covers everything (block == full dim is always
    # legal). No batch padding: the ragged edge block (if any) reads an
    # undefined tail and its out-of-bounds rows are dropped on write.
    align = 16 if use_bf16 else 8
    tb = _round_up(min(tile_b, batch), align)
    if tb >= batch:
        tb = batch
    grid = (pl.cdiv(batch, tb),)
    # VMEM use at tb=2048 is only a few MiB (x/out double buffers + (tb,128)
    # intermediates), well inside every generation's scoped limit; cap tile_b
    # around 2048-4096 on v7x (64 MiB physical VMEM) when sweeping upward.

    def resident(arr):
        # Full array, same block every grid step -> DMA'd once, stays in VMEM.
        return pl.BlockSpec(arr.shape, lambda i: (0, 0))

    # Advisory cost estimate from the true (unpadded) dims.
    flops = 2 * batch * (in_f * d1 + d1 * d2 + d2 * cls)
    bytes_accessed = sum(
        int(a.size) * jnp.dtype(a.dtype).itemsize
        for a in (x, w1, b1, w2, b2, w3, b3)
    ) + batch * cls * 4  # f32 output

    return pl.pallas_call(
        mlp_kernel,
        out_shape=jax.ShapeDtypeStruct((batch, cls), jnp.float32),
        grid=grid,
        in_specs=[
            # TODO(synk): if profiles at large tb show exposed x DMA, add
            # pipeline_mode=pl.Buffered(3) to this spec.
            pl.BlockSpec((tb, in_f), lambda i: (i, 0)),
            resident(w1), resident(b1),
            resident(w2), resident(b2),
            resident(w3), resident(b3),
        ],
        out_specs=pl.BlockSpec((tb, cls), lambda i: (i, 0)),
        compiler_params=pltpu.CompilerParams(
            # Batch axis is independent -> "parallel" (megacore on v7x).
            # If v7x profiling shows single-core execution, try
            # dimension_semantics=(pltpu.CORE_PARALLEL,).
            dimension_semantics=("parallel",)),
        cost_estimate=pl.CostEstimate(
            flops=flops, transcendentals=0, bytes_accessed=bytes_accessed),
    )(x, w1, b1, w2, b2, w3, b3)


def init_linear(key, in_features, out_features):
    # Deterministic init mimicking PyTorch nn.Linear default:
    # U(-1/sqrt(fan_in), 1/sqrt(fan_in)). Weight stored as (in, out).
    kw, kb = jax.random.split(key)
    bound = 1.0 / (in_features ** 0.5)
    w = jax.random.uniform(kw, (in_features, out_features), jnp.float32,
                           minval=-bound, maxval=bound)
    b = jax.random.uniform(kb, (out_features,), jnp.float32,
                           minval=-bound, maxval=bound)
    return w, b


def mlp_reference(x, w1, b1, w2, b2, w3, b3):
    h = jnp.maximum(x @ w1 + b1, 0.0)
    h = jnp.maximum(h @ w2 + b2, 0.0)
    return h @ w3 + b3


if __name__ == "__main__":
    # Module hyperparameters (small, consistent with the forward pass).
    input_size = 32
    output_size = 128
    hidden = 64          # fixed by the module (l3 -> 64)
    class_digits = 10
    batch = 8

    key = jax.random.PRNGKey(0)
    kx, k1, k2, k3, kx2 = jax.random.split(key, 5)

    x = jax.random.normal(kx, (batch, input_size), jnp.float32)
    w1, b1 = init_linear(k1, input_size, output_size)
    w2, b2 = init_linear(k2, output_size, hidden)
    w3, b3 = init_linear(k3, hidden, class_digits)

    ref = mlp_reference(x, w1, b1, w2, b2, w3, b3)

    # f32 path: must match the PyTorch-equivalent reference tightly.
    out = jax.block_until_ready(mlp_forward(x, w1, b1, w2, b2, w3, b3))
    assert out.shape == (batch, class_digits)
    assert jnp.allclose(out, ref, atol=1e-5, rtol=1e-5)

    # Ragged batch (batch not a multiple of the tile): exercises the masked
    # edge block introduced by removing batch padding.
    batch2 = 200
    x2 = jax.random.normal(kx2, (batch2, input_size), jnp.float32)
    ref2 = mlp_reference(x2, w1, b1, w2, b2, w3, b3)
    out2 = jax.block_until_ready(
        mlp_forward(x2, w1, b1, w2, b2, w3, b3, tile_b=64))
    assert out2.shape == (batch2, class_digits)
    assert jnp.allclose(out2, ref2, atol=1e-5, rtol=1e-5)

    # bf16 input+weight path (HBM-byte win for large batches): smoke test.
    out_bf16 = jax.block_until_ready(
        mlp_forward(x, w1, b1, w2, b2, w3, b3, use_bf16=True))
    assert out_bf16.shape == (batch, class_digits)
    assert bool(jnp.all(jnp.isfinite(out_bf16)))
    assert jnp.allclose(out_bf16, ref, atol=1e-1, rtol=1e-1)

    print("KERNEL_OK")
</pallas_src>

<mosaic_0001>
module attributes {stable_mosaic.version = 11 : i64} {
  func.func @mlp_kernel(%arg0: i32, %arg1: memref<8x32xf32, #tpu.memory_space<vmem>>, %arg2: memref<32x128xf32, #tpu.memory_space<vmem>>, %arg3: memref<1x128xf32, #tpu.memory_space<vmem>>, %arg4: memref<128x64xf32, #tpu.memory_space<vmem>>, %arg5: memref<1x64xf32, #tpu.memory_space<vmem>>, %arg6: memref<64x10xf32, #tpu.memory_space<vmem>>, %arg7: memref<1x10xf32, #tpu.memory_space<vmem>>, %arg8: memref<8x10xf32, #tpu.memory_space<vmem>>) attributes {dimension_semantics = [#tpu.dimension_semantics<parallel>], iteration_bounds = array<i64: 1>, scalar_prefetch = 0 : i64, scratch_operands = 0 : i64, tpu.core_type = #tpu.core_type<tc>, window_params = [{transform_indices = @transform_0, window_bounds = array<i64: 8, 32>}, {pipeline_mode = #tpu.pipeline_mode<synchronous>, transform_indices = @transform_1, window_bounds = array<i64: 32, 128>}, {pipeline_mode = #tpu.pipeline_mode<synchronous>, transform_indices = @transform_2, window_bounds = array<i64: 1, 128>}, {pipeline_mode = #tpu.pipeline_mode<synchronous>, transform_indices = @transform_3, window_bounds = array<i64: 128, 64>}, {pipeline_mode = #tpu.pipeline_mode<synchronous>, transform_indices = @transform_4, window_bounds = array<i64: 1, 64>}, {pipeline_mode = #tpu.pipeline_mode<synchronous>, transform_indices = @transform_5, window_bounds = array<i64: 64, 10>}, {pipeline_mode = #tpu.pipeline_mode<synchronous>, transform_indices = @transform_6, window_bounds = array<i64: 1, 10>}, {transform_indices = @transform_7, window_bounds = array<i64: 8, 10>}]} {
    %c0 = arith.constant 0 : index
    %c0_0 = arith.constant 0 : index
    %0 = vector.load %arg1[%c0, %c0_0] : memref<8x32xf32, #tpu.memory_space<vmem>>, vector<8x32xf32>
    %c0_1 = arith.constant 0 : index
    %c0_2 = arith.constant 0 : index
    %1 = vector.load %arg2[%c0_1, %c0_2] : memref<32x128xf32, #tpu.memory_space<vmem>>, vector<32x128xf32>
    %cst = arith.constant dense<0.000000e+00> : vector<8x128xf32>
    %2 = tpu.matmul %0, %1, %cst {dimension_numbers = #tpu.dot_dimension_numbers<[1], [0], [0], [1], [0, 0, 1, 1], [], []>} : vector<8x32xf32>, vector<32x128xf32>, vector<8x128xf32> -> vector<8x128xf32>
    %c0_3 = arith.constant 0 : index
    %c0_4 = arith.constant 0 : index
    %3 = vector.load %arg3[%c0_3, %c0_4] : memref<1x128xf32, #tpu.memory_space<vmem>>, vector<1x128xf32>
    %4 = vector.broadcast %3 : vector<1x128xf32> to vector<8x128xf32>
    %5 = arith.addf %2, %4 : vector<8x128xf32>
    %cst_5 = arith.constant 0.000000e+00 : f32
    %6 = vector.broadcast %cst_5 : f32 to vector<8x128xf32>
    %7 = arith.maximumf %5, %6 : vector<8x128xf32>
    %c0_6 = arith.constant 0 : index
    %c0_7 = arith.constant 0 : index
    %8 = vector.load %arg4[%c0_6, %c0_7] : memref<128x64xf32, #tpu.memory_space<vmem>>, vector<128x64xf32>
    %cst_8 = arith.constant dense<0.000000e+00> : vector<8x64xf32>
    %9 = tpu.matmul %7, %8, %cst_8 {dimension_numbers = #tpu.dot_dimension_numbers<[1], [0], [0], [1], [0, 0, 1, 1], [], []>} : vector<8x128xf32>, vector<128x64xf32>, vector<8x64xf32> -> vector<8x64xf32>
    %c0_9 = arith.constant 0 : index
    %c0_10 = arith.constant 0 : index
    %10 = vector.load %arg5[%c0_9, %c0_10] : memref<1x64xf32, #tpu.memory_space<vmem>>, vector<1x64xf32>
    %11 = vector.broadcast %10 : vector<1x64xf32> to vector<8x64xf32>
    %12 = arith.addf %9, %11 : vector<8x64xf32>
    %cst_11 = arith.constant 0.000000e+00 : f32
    %13 = vector.broadcast %cst_11 : f32 to vector<8x64xf32>
    %14 = arith.maximumf %12, %13 : vector<8x64xf32>
    %c0_12 = arith.constant 0 : index
    %c0_13 = arith.constant 0 : index
    %15 = vector.load %arg6[%c0_12, %c0_13] : memref<64x10xf32, #tpu.memory_space<vmem>>, vector<64x10xf32>
    %cst_14 = arith.constant dense<0.000000e+00> : vector<8x10xf32>
    %16 = tpu.matmul %14, %15, %cst_14 {dimension_numbers = #tpu.dot_dimension_numbers<[1], [0], [0], [1], [0, 0, 1, 1], [], []>} : vector<8x64xf32>, vector<64x10xf32>, vector<8x10xf32> -> vector<8x10xf32>
    %c0_15 = arith.constant 0 : index
    %c0_16 = arith.constant 0 : index
    %17 = vector.load %arg7[%c0_15, %c0_16] : memref<1x10xf32, #tpu.memory_space<vmem>>, vector<1x10xf32>
    %18 = vector.broadcast %17 : vector<1x10xf32> to vector<8x10xf32>
    %19 = arith.addf %16, %18 : vector<8x10xf32>
    %c0_17 = arith.constant 0 : index
    %c0_18 = arith.constant 0 : index
    %20 = vector.load %arg8[%c0_17, %c0_18] : memref<8x10xf32, #tpu.memory_space<vmem>>, vector<8x10xf32>
    tpu.vector_store %arg8[%c0_17, %c0_18], %19 {strides = array<i32>} : memref<8x10xf32, #tpu.memory_space<vmem>>, vector<8x10xf32>,
    return
  }
  func.func @transform_0(%arg0: i32) -> (i32, i32) {
    %c0_i32 = arith.constant 0 : i32
    %c0_i32_0 = arith.constant 0 : i32
    return %arg0, %c0_i32 : i32, i32
  }
  func.func @transform_1(%arg0: i32) -> (i32, i32) {
    %c0_i32 = arith.constant 0 : i32
    %c0_i32_0 = arith.constant 0 : i32
    %c0_i32_1 = arith.constant 0 : i32
    return %c0_i32, %c0_i32_0 : i32, i32
  }
  func.func @transform_2(%arg0: i32) -> (i32, i32) {
    %c0_i32 = arith.constant 0 : i32
    %c0_i32_0 = arith.constant 0 : i32
    %c0_i32_1 = arith.constant 0 : i32
    return %c0_i32, %c0_i32_0 : i32, i32
  }
  func.func @transform_3(%arg0: i32) -> (i32, i32) {
    %c0_i32 = arith.constant 0 : i32
    %c0_i32_0 = arith.constant 0 : i32
    %c0_i32_1 = arith.constant 0 : i32
    return %c0_i32, %c0_i32_0 : i32, i32
  }
  func.func @transform_4(%arg0: i32) -> (i32, i32) {
    %c0_i32 = arith.constant 0 : i32
    %c0_i32_0 = arith.constant 0 : i32
    %c0_i32_1 = arith.constant 0 : i32
    return %c0_i32, %c0_i32_0 : i32, i32
  }
  func.func @transform_5(%arg0: i32) -> (i32, i32) {
    %c0_i32 = arith.constant 0 : i32
    %c0_i32_0 = arith.constant 0 : i32
    %c0_i32_1 = arith.constant 0 : i32
    return %c0_i32, %c0_i32_0 : i32, i32
  }
  func.func @transform_6(%arg0: i32) -> (i32, i32) {
    %c0_i32 = arith.constant 0 : i32
    %c0_i32_0 = arith.constant 0 : i32
    %c0_i32_1 = arith.constant 0 : i32
    return %c0_i32, %c0_i32_0 : i32, i32
  }
  func.func @transform_7(%arg0: i32) -> (i32, i32) {
    %c0_i32 = arith.constant 0 : i32
    %c0_i32_0 = arith.constant 0 : i32
    return %arg0, %c0_i32 : i32, i32
  }
}

</mosaic_0001>

<bundles_post_ra>
// kernel: tpu_custom_call.1
= control target key start
LH: loop header
LB: loop body
LE: loop exit
PB: predicated region body
PF: predicated region fallthrough
CT: control target
= control target key end

     0   :  { %v484_v3 = vmov 0.0|0.0   ;;  %vm485_vm0 = vmmov 0   ;;  %v486_v6 = vmov 0.0   ;;  %s653_s0 = inlined_call_operand.vmem [shape: f32[8,32], index: 0, kind: input, shape index: {}]   ;;  %s654_s1 = inlined_call_operand.vmem [shape: f32[32,128], index: 1, kind: input, shape index: {}]   ;;  %s655_s2 = inlined_call_operand.vmem [shape: f32[1,128], index: 2, kind: input, shape index: {}]   ;;  %s656_s3 = inlined_call_operand.vmem [shape: f32[128,64], index: 3, kind: input, shape index: {}]   ;;  %s657_s4 = inlined_call_operand.vmem [shape: f32[1,64], index: 4, kind: input, shape index: {}]   ;;  %s658_s5 = inlined_call_operand.vmem [shape: f32[64,10], index: 5, kind: input, shape index: {}]   ;;  %s659_s6 = inlined_call_operand.vmem [shape: f32[1,10], index: 6, kind: input, shape index: {}]   ;;  %s660_s7 = inlined_call_operand.hbm [shape: f32[8,10], index: 7, kind: output, shape index: {}]  }
   0x1   :  { %v28_v0 = vld [vmem:[%s654_s1] sm:$0xff]  ;;  %v29_v1 = vld [vmem:[%s654_s1 + $0x8] sm:$0xff]  ;;  %v30_v2 = vld [vmem:[%s654_s1 + $0x10] sm:$0xff]  ;;  %414 = vmatprep.subr.bf16.mxu0 %v484_v3  ;;  %357 = vmatprep.mubr.msk.f32.mxu0 %vm485_vm0, %v486_v6 }
   0x2   :  { %v415_v4 = vpack.c.bf16 %v29_v1, %v28_v0  ;;  %v31_v5 = vld [vmem:[%s654_s1 + $0x18] sm:$0xff]  ;;  %v114_v7 = vld [vmem:[%s656_s3] sm:$0xff]  ;;  %420 = vmatprep.subr.bf16.mxu1 %v484_v3  ;;  %v115_v8 = vld [vmem:[%s656_s3 + $0x8] sm:$0xff]  ;;  %392 = vmatprep.mubr.msk.f32.mxu1 %vm485_vm0, %v486_v6 }
   0x3   :  { %v116_v9 = vld [vmem:[%s656_s3 + $0x10] sm:$0xff]  ;;  %v117_v10 = vld [vmem:[%s656_s3 + $0x18] sm:$0xff]  ;;  %v418_v11 = vpack.c.bf16 %v31_v5, %v30_v2  ;;  %v421_v12 = vpack.c.bf16 %v115_v8, %v114_v7  ;;  %v118_v14 = vld [vmem:[%s656_s3 + $0x20] sm:$0xff] }
   0x4   :  { %416 = vmatpush3.bf16.msra.mxu0 %v415_v4  ;;  %v424_v13 = vpack.c.bf16 %v117_v10, %v116_v9  ;;  %v119_v15 = vld [vmem:[%s656_s3 + $0x28] sm:$0xff] }
   0x5   :  { %417 = vmatprep.subr.bf16.mxu0 %v484_v3  ;;  %422 = vmatpush3.bf16.msra.mxu1 %v421_v12 }
   0x6   :  { %423 = vmatprep.subr.bf16.mxu1 %v484_v3 }
   0x7   :  { %12 = vsyncpa [#allocation3], 0  ;;  %v27_v16 = vld [vmem:[%s653_s0] sm:$0xff]  ;;  %vm39_vm1 = vcmask 261120   ;;  %v427_v17 = vpack.c.bf16 %v119_v15, %v118_v14  ;;  %v120_v18 = vld [vmem:[%s656_s3 + $0x30] sm:$0xff]  ;;  %vm223_vm2 = vcmask 523264  }
   0x8   :  { %419 = vmatpush3.bf16.msra.mxu0 %v418_v11  ;;  %v121_v19 = vld [vmem:[%s656_s3 + $0x38] sm:$0xff]  ;;  %v122_v21 = vld [vmem:[%s656_s3 + $0x40] sm:$0xff]  ;;  %v123_v22 = vld [vmem:[%s656_s3 + $0x48] sm:$0xff]  ;;  %s487_s13 = smov [#allocation2]   ;;  %vm297_vm3 = vcmask 80896  }
   0x9   :  { %444 = vmatprep.subr.bf16.mxu0 %v484_v3  ;;  %425 = vmatpush3.bf16.msra.mxu1 %v424_v13  ;;  %v430_v20 = vpack.c.bf16 %v121_v19, %v120_v18  ;;  %v433_v23 = vpack.c.bf16 %v123_v22, %v122_v21  ;;  %v124_v24 = vld [vmem:[%s656_s3 + $0x50] sm:$0xff]  ;;  %v125_v25 = vld [vmem:[%s656_s3 + $0x58] sm:$0xff]  ;;  %v126_v27 = vld [vmem:[%s656_s3 + $0x60] sm:$0xff]  ;;  %s305_s14 = sshll.u32 %s487_s13, 4  ;;  %s306_s14 = int_to_ptr.vmem [resolvable:$true] %s305_s14 }
   0xa   :  { %426 = vmatprep.subr.bf16.mxu1 %v484_v3  ;;  %v436_v26 = vpack.c.bf16 %v125_v25, %v124_v24  ;;  %v127_v28 = vld [vmem:[%s656_s3 + $0x68] sm:$0xff]  ;;  %v128_v30 = vld [vmem:[%s656_s3 + $0x70] sm:$0xff]  ;;  %v129_v31 = vld [vmem:[%s656_s3 + $0x78] sm:$0xff]  ;;  %p465_p1 = scmp.lt.s32.totalorder %s306_s14, %s306_s14 }
   0xb   :  { %358 = vmatmul.mubr.msk.f32.vlgmr.msra.gmra.mrb[0].mxu0 %vm39_vm1, %v27_v16  ;;  %v439_v29 = vpack.c.bf16 %v127_v28, %v126_v27  ;;  %v442_v32 = vpack.c.bf16 %v129_v31, %v128_v30  ;;  %v208_v33 = vld [vmem:[%s658_s5] sm:$0xff]  ;;  %v209_v34 = vld [vmem:[%s658_s5 + $0x8] sm:$0xff]  ;;  %v210_v35 = vld [vmem:[%s658_s5 + $0x10] sm:$0xff] }
   0xc   :  { %411 = vmatprep.mubr.msk.f32.mxu0 %vm485_vm0, %v486_v6  ;;  %v445_v36 = vpack.c.bf16 %v209_v34, %v208_v33  ;;  %v211_v37 = vld [vmem:[%s658_s5 + $0x18] sm:$0xff]  ;;  %v212_v39 = vld [vmem:[%s658_s5 + $0x20] sm:$0xff]  ;;  %v213_v40 = vld [vmem:[%s658_s5 + $0x28] sm:$0xff] }
   0xd   :  { %428 = vmatpush3.bf16.msra.mxu1 %v427_v17  ;;  %v448_v38 = vpack.c.bf16 %v211_v37, %v210_v35  ;;  %v451_v41 = vpack.c.bf16 %v213_v40, %v212_v39  ;;  %v313_v42 = vld [vmem:[%s655_s2] ss:$0 sm:$0xff]  ;;  %v214_v47 = vld [vmem:[%s658_s5 + $0x30] sm:$0xff]  ;;  %v215_v48 = vld [vmem:[%s658_s5 + $0x38] sm:$0xff]  ;;  %s460_s5 = scalar_lea.vmem %s306_s14, 128 }
   0xe   :  { %429 = vmatprep.subr.bf16.mxu1 %v484_v3  ;;  %446 = vmatpush3.bf16.msra.mxu0 %v445_v36  ;;  %v454_v49 = vpack.c.bf16 %v215_v48, %v214_v47  ;;  %v315_v50 = vld [vmem:[%s657_s4] ss:$0 sm:$0xff]  ;;  %p461_p0 = scmp.ne.s32.totalorder %s306_s14, %s460_s5  ;;  %p466_p2 = scmp.lt.s32.totalorder %s460_s5, %s460_s5 }
   0xf   :  { %447 = vmatprep.subr.bf16.mxu0 %v484_v3  ;;  %v316_v55 = vld [vmem:[%s659_s6] ss:$0 sm:$0xff] }
  0x10   :  { %p467_p3 = por %p466_p2, %p465_p1 }
  0x11   :  { %431 = vmatpush3.bf16.msra.mxu1 %v430_v20 }
  0x12   :  { %432 = vmatprep.subr.bf16.mxu1 %v484_v3  ;;  %449 = vmatpush3.bf16.msra.mxu0 %v448_v38  ;;  %p468_p4 = pnand %p467_p3, %p461_p0 }
  0x13   :  { %450 = vmatprep.subr.bf16.mxu0 %v484_v3 }
  0x15   :  { %434 = vmatpush3.bf16.msra.mxu1 %v433_v23 }
  0x16   :  { %435 = vmatprep.subr.bf16.mxu1 %v484_v3  ;;  %452 = vmatpush3.bf16.msra.mxu0 %v451_v41 }
  0x17   :  { %453 = vmatprep.subr.bf16.mxu0 %v484_v3 }
  0x19   :  { %437 = vmatpush3.bf16.msra.mxu1 %v436_v26 }
  0x1a   :  { %438 = vmatprep.subr.bf16.mxu1 %v484_v3  ;;  %455 = vmatpush3.bf16.msra.mxu0 %v454_v49 }
  0x1d   :  { %440 = vmatpush3.bf16.msra.mxu1 %v439_v29 }
  0x1e   :  { %441 = vmatprep.subr.bf16.mxu1 %v484_v3 }
  0x21   :  { %443 = vmatpush3.bf16.msra.mxu1 %v442_v32 }
  0xde   :  { %v109_v43 = vpop.f32.mrb[0].mxu0 }
  0xdf   :  { %v110_v44 = vadd.f32 %v313_v42, %v109_v43  ;;  %v359_v45 = vpop.f32.mrb[1].mxu0 }
  0xe1   :  { %v113_v46 = vmax.f32 %v110_v44, 0.0 }
  0xe3   :  { %393 = vmatmul.mubr.f32.vlgmr.msra.gmra.mrb[0].mxu1 %v113_v46 }
 0x1b6   :  { %v203_v51 = vpop.f32.mrb[0].mxu1 }
 0x1b7   :  { %v204_v52 = vadd.f32 %v315_v50, %v203_v51  ;;  %v394_v53 = vpop.f32.mrb[1].mxu1 }
 0x1b9   :  { %v207_v54 = vmax.f32 %v204_v52, 0.0 }
 0x1bb   :  { %412 = vmatmul.mubr.msk.f32.vlgmr.msra.gmra.mrb[2].mxu0 %vm223_vm2, %v207_v54 }
 0x28e   :  { %v293_v56 = vpop.f32.mrb[2].mxu0 }
 0x28f   :  { %v294_v57 = vadd.f32 %v316_v55, %v293_v56  ;;  %v413_v58 = vpop.f32.mrb[3].mxu0 }
 0x291   :  { %298 = vst.msk [vmem:[#allocation2] sm:$0xff] %vm297_vm3, %v294_v57 }
 0x292   :  { %471 = shalt.err (!%p468_p4)
}
 0x293   :  { %s472_s1 = scalar_lea.hbm %s660_s7, 128 }
 0x294   :  { %p473_p5 = scmp.ne.s32.totalorder %s660_s7, %s472_s1  ;;  %p476_p6 = scmp.lt.u32.totalorder %s472_s1, %s660_s7 }
 0x296   :  { %p478_p7 = pnand %p476_p6, %p473_p5 }
 0x298   :  { %481 = shalt.err (!%p478_p7)
}
 0x299   :  { %308 = dma.vmem_to_hbm [thread:$0]  %s306_s14, 128, %s660_s7, [#allocation3]  }
 0x29a   :  { %482 = dma.done.wait [#allocation3], 128  }
 0x29b   :  { %483 = vsyncadd [#allocation3], 4294967168 }
 0x29c   :  { %312 = vsyncpa [#allocation3], 1 }

</bundles_post_ra>
